<compile_context>
chip_gen: v7x
topology: tpu7x:2x2x1
jax: 0.10.0
libtpu: 0.0.40
codegen_flags: <defaults>
</compile_context>

<pallas_src>
import jax
import jax.numpy as jnp
import numpy as np
from jax.experimental import pallas as pl
from jax.experimental.pallas import tpu as pltpu


def _round_up(x: int, m: int) -> int:
    return ((x + m - 1) // m) * m


def linear_interp_matrix(l_in: int, l_out: int) -> jnp.ndarray:
    """Matrix A (l_in, l_out) s.t. x @ A == F.interpolate(x[:, None], l_out,
    mode='linear', align_corners=False).squeeze(1). Identity if sizes match
    (the module skips interpolation in that case)."""
    if l_in == l_out:
        return jnp.eye(l_in, dtype=jnp.float32)
    scale = l_in / l_out
    j = jnp.arange(l_out, dtype=jnp.float32)
    src = jnp.clip((j + 0.5) * scale - 0.5, 0.0, float(l_in - 1))
    lo = jnp.floor(src).astype(jnp.int32)
    hi = jnp.minimum(lo + 1, l_in - 1)
    wgt = src - lo.astype(jnp.float32)
    cols = jnp.arange(l_out)
    A = jnp.zeros((l_in, l_out), dtype=jnp.float32)
    A = A.at[lo, cols].add(1.0 - wgt)
    A = A.at[hi, cols].add(wgt)
    return A


def _make_kernel(S: int, E: int, out_dtype):
    def kernel(*refs):
        x_refs = refs[:S]            # S x (tile_n, L_s)   native dtype (f32)
        w_refs = refs[S:2 * S]       # S x (L_s, E)        bf16, VMEM-resident
        b_ref = refs[2 * S]          # (1, E)              f32, VMEM-resident
        o_ref = refs[2 * S + 1]      # (tile_n, S*E)       out_dtype
        bias = b_ref[...]
        parts = []
        for s in range(S):           # static unroll; S is small
            x = x_refs[s][...].astype(jnp.bfloat16)   # cast in VMEM, not via HBM
            acc = jnp.dot(x, w_refs[s][...], preferred_element_type=jnp.float32)
            parts.append((acc + bias).astype(out_dtype))
        # One full-block, lane-dense store of the packed (tile_n, S*E) slab.
        o_ref[...] = jnp.concatenate(parts, axis=-1)
    return kernel


def _vmem_need_bytes(tile_n, lengths, E, S, x_itemsizes, out_itemsize):
    lane = lambda d: _round_up(d, 128)
    x = sum(2 * tile_n * lane(L) * isz for L, isz in zip(lengths, x_itemsizes))
    w = sum(2 * _round_up(L, 8) * lane(E) * 2 for L in lengths)
    b = 2 * 8 * lane(E) * 4
    o = 2 * tile_n * lane(S * E) * out_itemsize
    return x + w + b + o


def time_series_embedding(time_series, w, b, resample_dim,
                          out_dtype=jnp.bfloat16):
    """time_series: list of S arrays of shape (N, L_s). Returns (N, S, E)."""
    S = len(time_series)
    N = int(time_series[0].shape[0])
    E = int(w.shape[1])
    R = int(resample_dim)
    lengths = [int(t.shape[1]) for t in time_series]

    # --- wrapper-side prep: tiny XLA work, never a pass over X ---------------
    # Fuse per-series interpolation with the projection: W_s = A_s @ W.
    ws = [(linear_interp_matrix(L, R) @ w.astype(jnp.float32)).astype(jnp.bfloat16)
          for L in lengths]                                    # S x (L_s, E)
    b_p = b.astype(jnp.float32).reshape(1, E)

    # Rows: pad only to the sublane multiple of 8 (only when actually needed).
    N_pad = _round_up(N, 8)
    xs = list(time_series)
    if N_pad != N:
        xs = [jnp.pad(t, ((0, N_pad - N), (0, 0))) for t in xs]

    # --- tiling: 1-D grid over row tiles; Ws / bias are VMEM-resident --------
    VMEM_BUDGET = 48 * 1024 * 1024        # fits v7x's 64 MiB/TC with headroom
    x_itemsizes = [jnp.dtype(t.dtype).itemsize for t in xs]
    out_isz = jnp.dtype(out_dtype).itemsize
    tile_n = min(512, N_pad)
    while tile_n > 8 and _vmem_need_bytes(tile_n, lengths, E, S,
                                          x_itemsizes, out_isz) > VMEM_BUDGET:
        tile_n = max(8, _round_up(tile_n // 2, 8))
    num_n_tiles = (N_pad + tile_n - 1) // tile_n
    need = _vmem_need_bytes(tile_n, lengths, E, S, x_itemsizes, out_isz)
    vmem_limit = int(min(VMEM_BUDGET, max(32 * 1024 * 1024, need + (4 << 20))))

    in_specs = (
        [pl.BlockSpec((tile_n, L), lambda n: (n, 0)) for L in lengths]   # X tiles
        + [pl.BlockSpec((L, E), lambda n: (0, 0)) for L in lengths]      # resident W_s
        + [pl.BlockSpec((1, E), lambda n: (0, 0))]                       # resident bias
    )

    flops = sum(2 * N_pad * L * E for L in lengths)
    bytes_accessed = (sum(N_pad * L * isz for L, isz in zip(lengths, x_itemsizes))
                      + sum(L * E * 2 for L in lengths) + E * 4
                      + N_pad * S * E * out_isz)

    y = pl.pallas_call(
        _make_kernel(S, E, out_dtype),
        out_shape=jax.ShapeDtypeStruct((N_pad, S * E), out_dtype),
        grid_spec=pltpu.PrefetchScalarGridSpec(
            num_scalar_prefetch=0,
            grid=(num_n_tiles,),
            in_specs=in_specs,
            # One slab of width exactly S*E: no E padding to slice off later,
            # and the (N, S, E) reshape below is free.
            out_specs=pl.BlockSpec((tile_n, S * E), lambda n: (n, 0)),
        ),
        compiler_params=pltpu.CompilerParams(
            dimension_semantics=("parallel",),   # megacore splits the N axis
            vmem_limit_bytes=vmem_limit,
        ),
        cost_estimate=pl.CostEstimate(flops=flops, transcendentals=0,
                                      bytes_accessed=bytes_accessed),
    )(*xs, *ws, b_p)

    out = y.reshape(N_pad, S, E)        # free: row-major split of last dim
    if N_pad != N:
        out = out[:N]                   # drop the (bias-only) padded rows
    return out


def reference(time_series, w, b, resample_dim):
    """Pure-JAX f32 reference replicating the PyTorch forward."""
    outs = []
    for t in time_series:
        A = linear_interp_matrix(int(t.shape[1]), resample_dim)
        r = t.astype(jnp.float32) @ A                 # resample (or identity)
        outs.append(r @ w + b[0])                     # Linear model
    return jnp.stack(outs, axis=1)                    # (N, S, E)


if __name__ == "__main__":
    key = jax.random.PRNGKey(0)
    k1, k2, k3, k4, k5 = jax.random.split(key, 5)

    N, R, E = 2, 16, 32
    lengths = [16, 24, 10]        # S=3 series; first already at resample_dim
    ts = [jax.random.normal(k, (N, L), dtype=jnp.float32)
          for k, L in zip([k1, k2, k3], lengths)]

    # Deterministic synthetic parameters for model = Linear(R, E)
    w = jax.random.normal(k4, (R, E), dtype=jnp.float32) * 0.02
    b = jax.random.normal(k5, (1, E), dtype=jnp.float32) * 0.01

    out = time_series_embedding(ts, w, b, R)
    out = jax.block_until_ready(out)

    ref = reference(ts, w, b, R)
    assert out.shape == (N, len(lengths), E), out.shape
    # bf16 MXU inputs + bf16 output -> compare against f32 reference loosely.
    np.testing.assert_allclose(np.asarray(out, dtype=np.float32),
                               np.asarray(ref), rtol=2e-2, atol=2e-2)
    print("KERNEL_OK")
</pallas_src>

<mosaic_0001>
module attributes {stable_mosaic.version = 11 : i64} {
  func.func @kernel(%arg0: i32, %arg1: memref<8x16xf32, #tpu.memory_space<vmem>>, %arg2: memref<8x24xf32, #tpu.memory_space<vmem>>, %arg3: memref<8x10xf32, #tpu.memory_space<vmem>>, %arg4: memref<16x32xbf16, #tpu.memory_space<vmem>>, %arg5: memref<24x32xbf16, #tpu.memory_space<vmem>>, %arg6: memref<10x32xbf16, #tpu.memory_space<vmem>>, %arg7: memref<1x32xf32, #tpu.memory_space<vmem>>, %arg8: memref<8x96xbf16, #tpu.memory_space<vmem>>) attributes {dimension_semantics = [#tpu.dimension_semantics<parallel>], iteration_bounds = array<i64: 1>, scalar_prefetch = 0 : i64, scratch_operands = 0 : i64, tpu.core_type = #tpu.core_type<tc>, window_params = [{transform_indices = @transform_0, window_bounds = array<i64: 8, 16>}, {transform_indices = @transform_1, window_bounds = array<i64: 8, 24>}, {transform_indices = @transform_2, window_bounds = array<i64: 8, 10>}, {pipeline_mode = #tpu.pipeline_mode<synchronous>, transform_indices = @transform_3, window_bounds = array<i64: 16, 32>}, {pipeline_mode = #tpu.pipeline_mode<synchronous>, transform_indices = @transform_4, window_bounds = array<i64: 24, 32>}, {pipeline_mode = #tpu.pipeline_mode<synchronous>, transform_indices = @transform_5, window_bounds = array<i64: 10, 32>}, {pipeline_mode = #tpu.pipeline_mode<synchronous>, transform_indices = @transform_6, window_bounds = array<i64: 1, 32>}, {transform_indices = @transform_7, window_bounds = array<i64: 8, 96>}]} {
    %c0 = arith.constant 0 : index
    %c0_0 = arith.constant 0 : index
    %0 = vector.load %arg7[%c0, %c0_0] : memref<1x32xf32, #tpu.memory_space<vmem>>, vector<1x32xf32>
    %c0_1 = arith.constant 0 : index
    %c0_2 = arith.constant 0 : index
    %1 = vector.load %arg1[%c0_1, %c0_2] : memref<8x16xf32, #tpu.memory_space<vmem>>, vector<8x16xf32>
    %2 = arith.truncf %1 : vector<8x16xf32> to vector<8x16xbf16>
    %c0_3 = arith.constant 0 : index
    %c0_4 = arith.constant 0 : index
    %3 = vector.load %arg4[%c0_3, %c0_4] : memref<16x32xbf16, #tpu.memory_space<vmem>>, vector<16x32xbf16>
    %cst = arith.constant dense<0.000000e+00> : vector<8x32xf32>
    %4 = tpu.matmul %2, %3, %cst {dimension_numbers = #tpu.dot_dimension_numbers<[1], [0], [0], [1], [0, 0, 1, 1], [], []>} : vector<8x16xbf16>, vector<16x32xbf16>, vector<8x32xf32> -> vector<8x32xf32>
    %5 = vector.broadcast %0 : vector<1x32xf32> to vector<8x32xf32>
    %6 = arith.addf %4, %5 : vector<8x32xf32>
    %7 = arith.truncf %6 : vector<8x32xf32> to vector<8x32xbf16>
    %c0_5 = arith.constant 0 : index
    %c0_6 = arith.constant 0 : index
    %8 = vector.load %arg2[%c0_5, %c0_6] : memref<8x24xf32, #tpu.memory_space<vmem>>, vector<8x24xf32>
    %9 = arith.truncf %8 : vector<8x24xf32> to vector<8x24xbf16>
    %c0_7 = arith.constant 0 : index
    %c0_8 = arith.constant 0 : index
    %10 = vector.load %arg5[%c0_7, %c0_8] : memref<24x32xbf16, #tpu.memory_space<vmem>>, vector<24x32xbf16>
    %cst_9 = arith.constant dense<0.000000e+00> : vector<8x32xf32>
    %11 = tpu.matmul %9, %10, %cst_9 {dimension_numbers = #tpu.dot_dimension_numbers<[1], [0], [0], [1], [0, 0, 1, 1], [], []>} : vector<8x24xbf16>, vector<24x32xbf16>, vector<8x32xf32> -> vector<8x32xf32>
    %12 = vector.broadcast %0 : vector<1x32xf32> to vector<8x32xf32>
    %13 = arith.addf %11, %12 : vector<8x32xf32>
    %14 = arith.truncf %13 : vector<8x32xf32> to vector<8x32xbf16>
    %c0_10 = arith.constant 0 : index
    %c0_11 = arith.constant 0 : index
    %15 = vector.load %arg3[%c0_10, %c0_11] : memref<8x10xf32, #tpu.memory_space<vmem>>, vector<8x10xf32>
    %16 = arith.truncf %15 : vector<8x10xf32> to vector<8x10xbf16>
    %c0_12 = arith.constant 0 : index
    %c0_13 = arith.constant 0 : index
    %17 = vector.load %arg6[%c0_12, %c0_13] : memref<10x32xbf16, #tpu.memory_space<vmem>>, vector<10x32xbf16>
    %cst_14 = arith.constant dense<0.000000e+00> : vector<8x32xf32>
    %18 = tpu.matmul %16, %17, %cst_14 {dimension_numbers = #tpu.dot_dimension_numbers<[1], [0], [0], [1], [0, 0, 1, 1], [], []>} : vector<8x10xbf16>, vector<10x32xbf16>, vector<8x32xf32> -> vector<8x32xf32>
    %19 = vector.broadcast %0 : vector<1x32xf32> to vector<8x32xf32>
    %20 = arith.addf %18, %19 : vector<8x32xf32>
    %21 = arith.truncf %20 : vector<8x32xf32> to vector<8x32xbf16>
    %22 = tpu.concatenate %7, %14, %21 in 1 : vector<8x32xbf16>, vector<8x32xbf16>, vector<8x32xbf16> -> vector<8x96xbf16>
    %c0_15 = arith.constant 0 : index
    %c0_16 = arith.constant 0 : index
    %23 = vector.load %arg8[%c0_15, %c0_16] : memref<8x96xbf16, #tpu.memory_space<vmem>>, vector<8x96xbf16>
    tpu.vector_store %arg8[%c0_15, %c0_16], %22 {strides = array<i32>} : memref<8x96xbf16, #tpu.memory_space<vmem>>, vector<8x96xbf16>,
    return
  }
  func.func @transform_0(%arg0: i32) -> (i32, i32) {
    %c0_i32 = arith.constant 0 : i32
    %c0_i32_0 = arith.constant 0 : i32
    return %arg0, %c0_i32 : i32, i32
  }
  func.func @transform_1(%arg0: i32) -> (i32, i32) {
    %c0_i32 = arith.constant 0 : i32
    %c0_i32_0 = arith.constant 0 : i32
    return %arg0, %c0_i32 : i32, i32
  }
  func.func @transform_2(%arg0: i32) -> (i32, i32) {
    %c0_i32 = arith.constant 0 : i32
    %c0_i32_0 = arith.constant 0 : i32
    return %arg0, %c0_i32 : i32, i32
  }
  func.func @transform_3(%arg0: i32) -> (i32, i32) {
    %c0_i32 = arith.constant 0 : i32
    %c0_i32_0 = arith.constant 0 : i32
    %c0_i32_1 = arith.constant 0 : i32
    return %c0_i32, %c0_i32_0 : i32, i32
  }
  func.func @transform_4(%arg0: i32) -> (i32, i32) {
    %c0_i32 = arith.constant 0 : i32
    %c0_i32_0 = arith.constant 0 : i32
    %c0_i32_1 = arith.constant 0 : i32
    return %c0_i32, %c0_i32_0 : i32, i32
  }
  func.func @transform_5(%arg0: i32) -> (i32, i32) {
    %c0_i32 = arith.constant 0 : i32
    %c0_i32_0 = arith.constant 0 : i32
    %c0_i32_1 = arith.constant 0 : i32
    return %c0_i32, %c0_i32_0 : i32, i32
  }
  func.func @transform_6(%arg0: i32) -> (i32, i32) {
    %c0_i32 = arith.constant 0 : i32
    %c0_i32_0 = arith.constant 0 : i32
    %c0_i32_1 = arith.constant 0 : i32
    return %c0_i32, %c0_i32_0 : i32, i32
  }
  func.func @transform_7(%arg0: i32) -> (i32, i32) {
    %c0_i32 = arith.constant 0 : i32
    %c0_i32_0 = arith.constant 0 : i32
    return %arg0, %c0_i32 : i32, i32
  }
}

</mosaic_0001>

<bundles_post_ra>
// kernel: tpu_custom_call.1
= control target key start
LH: loop header
LB: loop body
LE: loop exit
PB: predicated region body
PF: predicated region fallthrough
CT: control target
= control target key end

     0   :  { %12 = vsyncpa [#allocation3], 0  ;;  %s645_s0 = inlined_call_operand.hbm [shape: f32[8,16], index: 0, kind: input, shape index: {}]   ;;  %s646_s1 = inlined_call_operand.hbm [shape: f32[8,24], index: 1, kind: input, shape index: {}]   ;;  %s647_s2 = inlined_call_operand.hbm [shape: f32[8,10], index: 2, kind: input, shape index: {}]   ;;  %s648_s3 = inlined_call_operand.hbm [shape: bf16[16,32], index: 3, kind: input, shape index: {}]   ;;  %s649_s4 = inlined_call_operand.vmem [shape: bf16[24,32], index: 4, kind: input, shape index: {}]   ;;  %s650_s5 = inlined_call_operand.hbm [shape: bf16[10,32], index: 5, kind: input, shape index: {}]   ;;  %s651_s6 = inlined_call_operand.vmem [shape: f32[1,32], index: 6, kind: input, shape index: {}]   ;;  %s652_s7 = inlined_call_operand.hbm [shape: bf16[8,96], index: 7, kind: output, shape index: {}]  }
   0x1   :  { %13 = vsyncpa [#allocation6], 0 }
   0x2   :  { %14 = vsyncpa [#allocation9], 0 }
   0x3   :  { %15 = vsyncpa [#allocation4], 0  ;;  %s496_s24 = smov [#allocation5]   ;;  %s497_s26 = smov [#allocation8]  }
   0x4   :  { %s32_s25 = sshll.u32 %s496_s24, 4  ;;  %s51_s27 = sshll.u32 %s497_s26, 4  ;;  %s33_s25 = int_to_ptr.vmem [resolvable:$true] %s32_s25  ;;  %s547_s27 = int_to_ptr.vmem [resolvable:$true] %s51_s27 }
   0x5   :  { %s356_s30 = scalar_lea.hbm %s646_s1, 128 }
   0x6   :  { %p357_p0 = scmp.ne.s32.totalorder %s646_s1, %s356_s30  ;;  %p360_p1 = scmp.lt.u32.totalorder %s356_s30, %s646_s1 }
   0x8   :  { %p362_p2 = pnand %p360_p1, %p357_p0 }
   0xa   :  { %365 = shalt.err (!%p362_p2)
}
   0xb   :  { %s366_s12 = scalar_lea.vmem %s33_s25, 128  ;;  %p371_p4 = scmp.lt.s32.totalorder %s33_s25, %s33_s25 }
   0xc   :  { %p367_p3 = scmp.ne.s32.totalorder %s33_s25, %s366_s12  ;;  %p372_p5 = scmp.lt.s32.totalorder %s366_s12, %s366_s12 }
   0xe   :  { %p373_p6 = por %p372_p5, %p371_p4 }
  0x10   :  { %p374_p7 = pnand %p373_p6, %p367_p3 }
  0x12   :  { %377 = shalt.err (!%p374_p7)
}
  0x13   :  { %35 = dma.hbm_to_vmem [thread:$0]  %s646_s1, 128, %s33_s25, [#allocation6]  }
  0x14   :  { %s378_s17 = scalar_lea.hbm %s648_s3, 128 }
  0x15   :  { %p379_p8 = scmp.ne.s32.totalorder %s648_s3, %s378_s17  ;;  %p382_p9 = scmp.lt.u32.totalorder %s378_s17, %s648_s3 }
  0x17   :  { %p384_p10 = pnand %p382_p9, %p379_p8 }
  0x19   :  { %387 = shalt.err (!%p384_p10)
}
  0x1a   :  { %s388_s22 = scalar_lea.vmem %s547_s27, 128  ;;  %p393_p12 = scmp.lt.s32.totalorder %s547_s27, %s547_s27 }
  0x1b   :  { %p389_p11 = scmp.ne.s32.totalorder %s547_s27, %s388_s22  ;;  %p394_p13 = scmp.lt.s32.totalorder %s388_s22, %s388_s22 }
  0x1d   :  { %p395_p0 = por %p394_p13, %p393_p12 }
  0x1f   :  { %p396_p1 = pnand %p395_p0, %p389_p11 }
  0x21   :  { %399 = shalt.err (!%p396_p1)
}
  0x22   :  { %s498_s1 = smov 64   ;;  %s499_s23 = smov 4  }
  0x23   :  { %57 = dma.hbm_to_vmem [thread:$0]  %s648_s3, 128, %s547_s27, [#allocation9], %s498_s1, %s498_s1, %s499_s23  }
  0x24   :  { %s500_s26 = smov [#allocation2]   ;;  %s501_s29 = smov [#allocation7]  }
  0x25   :  { %s22_s28 = sshll.u32 %s500_s26, 4  ;;  %s42_s30 = sshll.u32 %s501_s29, 4  ;;  %s23_s28 = int_to_ptr.vmem [resolvable:$true] %s22_s28  ;;  %s43_s30 = int_to_ptr.vmem [resolvable:$true] %s42_s30 }
  0x26   :  { %s400_s10 = scalar_lea.hbm %s645_s0, 128 }
  0x27   :  { %p401_p2 = scmp.ne.s32.totalorder %s645_s0, %s400_s10  ;;  %p404_p3 = scmp.lt.u32.totalorder %s400_s10, %s645_s0 }
  0x29   :  { %p406_p4 = pnand %p404_p3, %p401_p2 }
  0x2b   :  { %409 = shalt.err (!%p406_p4)
}
  0x2c   :  { %s410_s3 = scalar_lea.vmem %s23_s28, 128  ;;  %p415_p6 = scmp.lt.s32.totalorder %s23_s28, %s23_s28 }
  0x2d   :  { %p411_p5 = scmp.ne.s32.totalorder %s23_s28, %s410_s3  ;;  %p416_p7 = scmp.lt.s32.totalorder %s410_s3, %s410_s3 }
  0x2f   :  { %p417_p8 = por %p416_p7, %p415_p6 }
  0x31   :  { %p418_p9 = pnand %p417_p8, %p411_p5 }
  0x33   :  { %421 = shalt.err (!%p418_p9)
}
  0x34   :  { %25 = dma.hbm_to_vmem [thread:$0]  %s645_s0, 128, %s23_s28, [#allocation3]  }
  0x35   :  { %s422_s18 = scalar_lea.hbm %s647_s2, 128 }
  0x36   :  { %p423_p10 = scmp.ne.s32.totalorder %s647_s2, %s422_s18  ;;  %p426_p11 = scmp.lt.u32.totalorder %s422_s18, %s647_s2 }
  0x38   :  { %p428_p12 = pnand %p426_p11, %p423_p10 }
  0x3a   :  { %431 = shalt.err (!%p428_p12)
}
  0x3b   :  { %s432_s24 = scalar_lea.vmem %s43_s30, 128  ;;  %p437_p0 = scmp.lt.s32.totalorder %s43_s30, %s43_s30 }
  0x3c   :  { %p433_p13 = scmp.ne.s32.totalorder %s43_s30, %s432_s24  ;;  %p438_p1 = scmp.lt.s32.totalorder %s432_s24, %s432_s24 }
  0x3e   :  { %p439_p2 = por %p438_p1, %p437_p0 }
  0x40   :  { %p440_p3 = pnand %p439_p2, %p433_p13 }
  0x42   :  { %443 = shalt.err (!%p440_p3)
}
  0x43   :  { %45 = dma.hbm_to_vmem [thread:$0]  %s647_s2, 128, %s43_s30, [#allocation6]  }
  0x44   :  { %s502_s26 = smov [#allocation10]   ;;  %s444_s9 = scalar_lea.hbm %s650_s5, 128 }
  0x45   :  { %s65_s28 = sshll.u32 %s502_s26, 4  ;;  %p445_p4 = scmp.ne.s32.totalorder %s650_s5, %s444_s9  ;;  %s66_s28 = int_to_ptr.vmem [resolvable:$true] %s65_s28 }
  0x46   :  { %p448_p5 = scmp.lt.u32.totalorder %s444_s9, %s650_s5 }
  0x48   :  { %p450_p6 = pnand %p448_p5, %p445_p4 }
  0x4a   :  { %453 = shalt.err (!%p450_p6)
}
  0x4b   :  { %s454_s14 = scalar_lea.vmem %s66_s28, 128  ;;  %p459_p8 = scmp.lt.s32.totalorder %s66_s28, %s66_s28 }
  0x4c   :  { %p455_p7 = scmp.ne.s32.totalorder %s66_s28, %s454_s14  ;;  %p460_p9 = scmp.lt.s32.totalorder %s454_s14, %s454_s14 }
  0x4e   :  { %p461_p10 = por %p460_p9, %p459_p8 }
  0x50   :  { %p462_p11 = pnand %p461_p10, %p455_p7 }
  0x52   :  { %465 = shalt.err (!%p462_p11)
}
  0x53   :  { %71 = dma.hbm_to_vmem [thread:$0]  %s650_s5, 128, %s66_s28, [#allocation9], %s498_s1, %s498_s1, %s499_s23  }
  0x54   :  { %488 = dma.done.wait [#allocation3], 128  }
  0x55   :  { %489 = vsyncadd [#allocation3], 4294967168 }
  0x56   :  { %490 = dma.done.wait [#allocation6], 256  }
  0x57   :  { %491 = vsyncadd [#allocation6], 4294967040 }
  0x58   :  { %492 = dma.done.wait [#allocation9], 256  }
  0x59   :  { %493 = vsyncadd [#allocation9], 4294967040  ;;  %v503_v0 = vmov 0.0   ;;  %vm504_vm0 = vmmov 0   ;;  %v352_v1 = vld [vmem:[#allocation8] sm:$0xff]   ;;  %vm107_vm1 = vcmask 130048  }
  0x5a   :  { %321 = vmatprep.subr.bf16.mxu0 %v503_v0  ;;  %327 = vmatprep.subr.bf16.mxu1 %v503_v0  ;;  %v353_v2 = vld [vmem:[%s649_s4] sm:$0xff]   ;;  %vm170_vm2 = vcmask 1043456   ;;  %v91_v3 = vld [vmem:[#allocation2] sm:$0xff]  ;;  %v354_v4 = vld [vmem:[%s649_s4 + $0x8] ss:$0 sps:$4 sm:$0xff]   ;;  %vm228_vm3 = vcmask 1044480  }
  0x5b   :  { %323 = vmatprep.mubr.msk.bf16.mxu0 %vm504_vm0, %v503_v0  ;;  %331 = vmatprep.mubr.msk.bf16.mxu1 %vm504_vm0, %v503_v0  ;;  %v92_v5 = vpack.c.bf16 %v91_v3, %v91_v3  ;;  %v355_v6 = vld [vmem:[#allocation10] sm:$0x1f]   ;;  %v172_v7 = vsel %vm170_vm2, %v354_v4, 0  ;;  %v152_v8 = vld [vmem:[#allocation5] sm:$0xff]  ;;  %v215_v11 = vld [vmem:[#allocation7] sm:$0xff]  ;;  %vm166_vm4 = vcmask 195584  }
  0x5c   :  { %322 = vmatpush3.bf16.msra.mxu0 %v352_v1  ;;  %328 = vmatpush3.bf16.msra.mxu1 %v353_v2  ;;  %v230_v9 = vsel %vm228_vm3, %v355_v6, 0  ;;  %v153_v10 = vpack.c.bf16 %v152_v8, %v152_v8  ;;  %v216_v12 = vpack.c.bf16 %v215_v11, %v215_v11  ;;  %vm224_vm5 = vcmask 80896   ;;  %v306_v13 = vld [vmem:[%s651_s6] ss:$0 sm:$0xff]  ;;  %s505_s16 = smov 32   ;;  %s506_s6 = smov [#allocation11]  }
  0x5d   :  { %335 = vmatprep.subr.bf16.mxu0 %v503_v0  ;;  %329 = vmatprep.subr.bf16.mxu1 %v503_v0  ;;  %vm279_vm6 = vcmask 261120   ;;  %s295_s17 = sshll.u32 %s506_s6, 4  ;;  %vm283_vm7 = vcmask 523264   ;;  %vm287_vm8 = vcmask 781312   ;;  %s296_s17 = int_to_ptr.vmem [resolvable:$true] %s295_s17 }
  0x5e   :  { %s466_s18 = scalar_lea.vmem %s296_s17, 64  ;;  %p471_p13 = scmp.lt.s32.totalorder %s296_s17, %s296_s17 }
  0x5f   :  { %324 = vmatmul.mubr.msk.bf16.vlgmr.msra.gmra.mrb[0].mxu0 %vm107_vm1, %v92_v5  ;;  %p467_p12 = scmp.ne.s32.totalorder %s296_s17, %s466_s18  ;;  %p472_p0 = scmp.lt.s32.totalorder %s466_s18, %s466_s18 }
  0x60   :  { %336 = vmatpush3.bf16.msra.mxu0 %v230_v9  ;;  %337 = vmatprep.mubr.msk.bf16.mxu0 %vm504_vm0, %v503_v0 }
  0x61   :  { %330 = vmatpush3.bf16.msra.mxu1 %v172_v7  ;;  %p473_p1 = por %p472_p0, %p471_p13 }
  0x63   :  { %p474_p2 = pnand %p473_p1, %p467_p12 }
  0x64   :  { %332 = vmatmul.mubr.msk.bf16.vlgmr.msra.gmra.mrb[0].mxu1 %vm166_vm4, %v153_v10 }
  0x67   :  { %338 = vmatmul.mubr.msk.bf16.vlgmr.msra.gmra.mrb[4].mxu0 %vm224_vm5, %v216_v12 }
 0x132   :  { %v145_v14 = vpop.f32.mrb[0].mxu0 }
 0x133   :  { %v146_v15 = vadd.f32 %v306_v13, %v145_v14  ;;  %v325_v16 = vpop.f32.mrb[1].mxu0 }
 0x134   :  { %v148_v17 = vpop.f32.mrb[2].mxu0 }
 0x135   :  { %v326_v18 = vpop.f32.mrb[3].mxu0  ;;  %v151_v32 = vpack.c.bf16 %v146_v15, %v146_v15 }
 0x137   :  { %v208_v19 = vpop.f32.mrb[0].mxu1 }
 0x138   :  { %v209_v20 = vadd.f32 %v306_v13, %v208_v19  ;;  %v333_v21 = vpop.f32.mrb[1].mxu1 }
 0x139   :  { %v211_v22 = vpop.f32.mrb[2].mxu1 }
 0x13a   :  { %v214_v23 = vpack.c.bf16 %v209_v20, %v209_v20  ;;  %v334_v24 = vpop.f32.mrb[3].mxu1  ;;  %v266_v25 = vpop.f32.mrb[4].mxu0 }
 0x13b   :  { %v267_v26 = vadd.f32 %v306_v13, %v266_v25  ;;  %v339_v27 = vpop.f32.mrb[5].mxu0 }
 0x13c   :  { %274 = vrot.lane.b32.xlu0 %v214_v23, %s505_s16  ;;  %v269_v28 = vpop.f32.mrb[6].mxu0 }
 0x13d   :  { %v272_v29 = vpack.c.bf16 %v267_v26, %v267_v26  ;;  %v340_v30 = vpop.f32.mrb[7].mxu0 }
 0x140   :  { %277 = vrot.lane.b32.xlu0 %v272_v29, %s498_s1 }
 0x1ae   :  { %v275_v31 = vpop.permute.xlu0 %274 }
 0x1af   :  { %v282_v33 = vsel %vm279_vm6, %v151_v32, %v275_v31 }
 0x1b2   :  { %v278_v34 = vpop.permute.xlu0 %277 }
 0x1b3   :  { %v285_v35 = vsel %vm283_vm7, %v282_v33, %v278_v34 }
 0x1b4   :  { %288 = vst.msk [vmem:[#allocation11] sm:$0xf] %vm287_vm8, %v285_v35 }
 0x1b5   :  { %477 = shalt.err (!%p474_p2)
}
 0x1b6   :  { %s478_s20 = scalar_lea.hbm %s652_s7, 64 }
 0x1b7   :  { %p479_p3 = scmp.ne.s32.totalorder %s652_s7, %s478_s20  ;;  %p482_p4 = scmp.lt.u32.totalorder %s478_s20, %s652_s7 }
 0x1b9   :  { %p484_p5 = pnand %p482_p4, %p479_p3 }
 0x1bb   :  { %487 = shalt.err (!%p484_p5)
}
 0x1bc   :  { %298 = dma.vmem_to_hbm [thread:$0]  %s296_s17, 64, %s652_s7, [#allocation4]  }
 0x1bd   :  { %494 = dma.done.wait [#allocation4], 64  }
 0x1be   :  { %495 = vsyncadd [#allocation4], 4294967232 }
 0x1bf   :  { %302 = vsyncpa [#allocation3], 1 }
 0x1c0   :  { %303 = vsyncpa [#allocation6], 1 }
 0x1c1   :  { %304 = vsyncpa [#allocation9], 1 }
 0x1c2   :  { %305 = vsyncpa [#allocation4], 1 }

</bundles_post_ra>
